<compile_context>
chip_gen: v5e
topology: v5e:2x2
jax: 0.10.0
libtpu: 0.0.40
codegen_flags: <defaults>
</compile_context>

<pallas_src>
import jax
import jax.numpy as jnp
from jax.experimental import pallas as pl
from jax.experimental.pallas import tpu as pltpu

N_TYPES = 7          # len(BreakthroughType)
_OUT_W = 16          # fused output slab: [probs(7) | conf(1) | imp(1) | pad(7)]
_HEAD_PAD = 128      # lane-dense padded head width: [type(7)|conf_h(32)|imp_h(32)|0(57)]


def _breakthrough_kernel(
    x_ref,                 # (TILE_B, D)     caller dtype (f32); cast to cdtype in-kernel
    w1_ref, b1_ref,        # (D, H)  cdtype, (1, H)   f32
    w2_ref, b2_ref,        # (H, H2) cdtype, (1, H2)  f32
    wh_ref, bh_ref,        # (H2, 128) cdtype, (1, 128) f32  fused+padded head weights
    wc2_ref, bc2_ref,      # (1, 128) f32 (zero outside conf lanes), (1, 1) f32
    wi2_ref, bi2_ref,      # (1, 128) f32 (zero outside imp lanes),  (1, 1) f32
    out_ref,               # (TILE_B, 16) f32
):
    cdtype = w1_ref.dtype

    # Per-tile cast of the input (VPU work, hidden under the input DMA).
    x = x_ref[...].astype(cdtype)

    # --- feature extractor (Dropout = identity at inference) ---
    h1 = jnp.dot(x, w1_ref[...], preferred_element_type=jnp.float32)
    h1 = jnp.maximum(h1 + b1_ref[...], 0.0).astype(cdtype)
    h2 = jnp.dot(h1, w2_ref[...], preferred_element_type=jnp.float32)
    feats = jnp.maximum(h2 + b2_ref[...], 0.0).astype(cdtype)

    # --- fused, lane-dense heads: [type_logits(7) | conf_hidden(32) | imp_hidden(32) | 0] ---
    heads = jnp.dot(feats, wh_ref[...], preferred_element_type=jnp.float32) + bh_ref[...]
    relu_h = jnp.maximum(heads, 0.0)

    # Softmax over the first 7 lanes via an iota mask (no arbitrary-offset lane slice).
    lane = jax.lax.broadcasted_iota(jnp.int32, heads.shape, 1)
    logits = jnp.where(lane < N_TYPES, heads, -jnp.inf)
    m = jnp.max(logits, axis=-1, keepdims=True)
    e = jnp.exp(logits - m)                       # masked lanes -> exp(-inf) = 0
    probs = e / jnp.sum(e, axis=-1, keepdims=True)  # exact divide: rows sum to 1

    # (32 -> 1) projections as full-width VPU multiply + lane reduce; the logit and
    # pad lanes of relu_h multiply by zero-padded weight lanes, so no slicing needed.
    conf = jax.nn.sigmoid(
        jnp.sum(relu_h * wc2_ref[...], axis=-1, keepdims=True) + bc2_ref[...])
    imp = jax.nn.sigmoid(
        jnp.sum(relu_h * wi2_ref[...], axis=-1, keepdims=True) + bi2_ref[...])

    # Assemble the 16-wide output slab (no concatenate): lanes 0..6 = probs,
    # lane 7 = conf, lane 8 = imp, lanes 9..15 = 0 (probs lanes >= 7 are exact zeros).
    slab = probs[:, :_OUT_W]
    lane16 = jax.lax.broadcasted_iota(jnp.int32, slab.shape, 1)
    slab = slab + jnp.where(lane16 == N_TYPES, conf, 0.0) \
                + jnp.where(lane16 == N_TYPES + 1, imp, 0.0)
    out_ref[...] = slab                            # single (masked, 16-lane) store


def _round_up(n, m):
    return ((n + m - 1) // m) * m


def breakthrough_detection_forward(x, params, *, compute_dtype=jnp.bfloat16, tile_b=4096):
    """x: (B, input_dim) float32 (or bf16). params from init_params (weights (in, out)).

    Returns (type_probs (B, 7), confidence (B, 1), impact (B, 1)), all float32.
    """
    B, D = x.shape
    H = params["w1"].shape[1]
    H2 = params["w2"].shape[1]

    # Batch tiling without padding or wrapper-side casts: the kernel streams the
    # caller's rows directly; a partial last block is allowed (its out-of-bounds rows
    # produce garbage that never leaves the sliced-off region below).
    tile_b = int(tile_b)
    if B <= tile_b:
        tile_b = B                                   # single full-dim block
        nb = 1
    else:
        # Aim for >= 8 grid steps once B is large (v7x dual-TC sharding, pipelining),
        # but never shrink the tile below 1024 rows (per-step overhead amortization).
        tile_b = _round_up(min(tile_b, max(1024, pl.cdiv(B, 8))), 8)
        nb = pl.cdiv(B, tile_b)

    cdtype = compute_dtype
    w1 = params["w1"].astype(cdtype)
    w2 = params["w2"].astype(cdtype)
    b1 = params["b1"].astype(jnp.float32)
    b2 = params["b2"].astype(jnp.float32)

    # Fused + zero-padded head weights/biases (lane-dense 128-wide MXU output).
    wh = jnp.concatenate([params["wt"], params["wc1"], params["wi1"]], axis=1)
    bh = jnp.concatenate([params["bt"], params["bc1"], params["bi1"]], axis=1)
    head_w = wh.shape[1]                              # 7 + 32 + 32 = 71
    wh = jnp.pad(wh, ((0, 0), (0, _HEAD_PAD - head_w))).astype(cdtype)
    bh = jnp.pad(bh, ((0, 0), (0, _HEAD_PAD - head_w))).astype(jnp.float32)

    # Zero-extended (1, 128) projection rows for the conf/imp heads.
    wc2 = jnp.zeros((1, _HEAD_PAD), jnp.float32).at[
        :, N_TYPES:N_TYPES + 32].set(params["wc2"].T.astype(jnp.float32))
    wi2 = jnp.zeros((1, _HEAD_PAD), jnp.float32).at[
        :, N_TYPES + 32:N_TYPES + 64].set(params["wi2"].T.astype(jnp.float32))
    bc2 = params["bc2"].astype(jnp.float32)           # (1, 1)
    bi2 = params["bi2"].astype(jnp.float32)           # (1, 1)

    def resident(arr):
        # Full-array block with a constant index_map -> stays in VMEM across grid steps
        # (no re-DMA once the block index stops changing).
        return pl.BlockSpec(arr.shape, lambda i: (0, 0))

    in_specs = [
        pl.BlockSpec((tile_b, D), lambda i: (i, 0)),   # x: streamed over the batch grid
        resident(w1), resident(b1),
        resident(w2), resident(b2),
        resident(wh), resident(bh),
        resident(wc2), resident(bc2),
        resident(wi2), resident(bi2),
    ]
    out_spec = pl.BlockSpec((tile_b, _OUT_W), lambda i: (i, 0))

    bytes_in = x.size * x.dtype.itemsize + sum(
        a.size * a.dtype.itemsize
        for a in (w1, b1, w2, b2, wh, bh, wc2, bc2, wi2, bi2))
    cost = pl.CostEstimate(
        flops=2 * B * (D * H + H * H2 + H2 * _HEAD_PAD + 2 * _HEAD_PAD),
        transcendentals=B * (_HEAD_PAD + 4),
        bytes_accessed=bytes_in + B * _OUT_W * 4,
    )

    fused = pl.pallas_call(
        _breakthrough_kernel,
        out_shape=jax.ShapeDtypeStruct((B, _OUT_W), jnp.float32),
        grid=(nb,),
        in_specs=in_specs,
        out_specs=out_spec,
        compiler_params=pltpu.CompilerParams(
            dimension_semantics=("parallel",),   # v7x: shard the batch grid over both TCs
        ),
        cost_estimate=cost,
    )(x, w1, b1, w2, b2, wh, bh, wc2, bc2, wi2, bi2)

    type_probs = fused[:, 0:N_TYPES]
    confidence = fused[:, N_TYPES:N_TYPES + 1]
    impact = fused[:, N_TYPES + 1:N_TYPES + 2]
    return type_probs, confidence, impact


def init_params(key, input_dim, hidden_dim):
    """Deterministic init mimicking PyTorch nn.Linear default (uniform +/- 1/sqrt(fan_in)).
    Weights are stored transposed: (in_features, out_features)."""
    def linear(k, fan_in, fan_out):
        kw, kb = jax.random.split(k)
        bound = 1.0 / jnp.sqrt(fan_in)
        w = jax.random.uniform(kw, (fan_in, fan_out), jnp.float32, -bound, bound)
        b = jax.random.uniform(kb, (1, fan_out), jnp.float32, -bound, bound)
        return w, b

    h2 = hidden_dim // 2
    keys = jax.random.split(key, 7)
    w1, b1 = linear(keys[0], input_dim, hidden_dim)
    w2, b2 = linear(keys[1], hidden_dim, h2)
    wt, bt = linear(keys[2], h2, N_TYPES)
    wc1, bc1 = linear(keys[3], h2, 32)
    wc2, bc2 = linear(keys[4], 32, 1)
    wi1, bi1 = linear(keys[5], h2, 32)
    wi2, bi2 = linear(keys[6], 32, 1)
    return dict(
        w1=w1, b1=b1, w2=w2, b2=b2, wt=wt, bt=bt,
        wc1=wc1, bc1=bc1, wc2=wc2, bc2=bc2,
        wi1=wi1, bi1=bi1, wi2=wi2, bi2=bi2,
    )


def reference_forward(x, p):
    """Pure-JAX reference matching the PyTorch module (inference mode)."""
    h = jnp.maximum(x @ p["w1"] + p["b1"], 0.0)
    f = jnp.maximum(h @ p["w2"] + p["b2"], 0.0)
    tp = jax.nn.softmax(f @ p["wt"] + p["bt"], axis=-1)
    c = jax.nn.sigmoid(jnp.maximum(f @ p["wc1"] + p["bc1"], 0.0) @ p["wc2"] + p["bc2"])
    i = jax.nn.sigmoid(jnp.maximum(f @ p["wi1"] + p["bi1"], 0.0) @ p["wi2"] + p["bi2"])
    return tp, c, i


if __name__ == "__main__":
    # TODO(synk): nn.Dropout(0.2) is treated as identity (inference); no train-mode RNG mask.
    key = jax.random.PRNGKey(0)
    k_x, k_p = jax.random.split(key)

    batch = 8
    input_dim = 32
    hidden_dim = 64   # hidden_dim // 2 = 32

    x = jax.random.normal(k_x, (batch, input_dim), dtype=jnp.float32)
    params = init_params(k_p, input_dim, hidden_dim)
    tp_ref, c_ref, i_ref = reference_forward(x, params)

    # f32 matmul-input path (tight correctness check)
    tp, c, i = breakthrough_detection_forward(x, params, compute_dtype=jnp.float32)
    jax.block_until_ready((tp, c, i))
    assert tp.shape == (batch, N_TYPES)
    assert c.shape == (batch, 1)
    assert i.shape == (batch, 1)
    assert jnp.allclose(tp, tp_ref, atol=2e-3)
    assert jnp.allclose(c, c_ref, atol=2e-3)
    assert jnp.allclose(i, i_ref, atol=2e-3)
    assert jnp.allclose(jnp.sum(tp, axis=-1), 1.0, atol=1e-5)

    # bf16 matmul-input path (default on all TPU generations; f32 accumulate/elementwise)
    tp_b, c_b, i_b = breakthrough_detection_forward(x, params, compute_dtype=jnp.bfloat16)
    jax.block_until_ready((tp_b, c_b, i_b))
    assert jnp.allclose(tp_b, tp_ref, atol=5e-2)
    assert jnp.allclose(c_b, c_ref, atol=5e-2)
    assert jnp.allclose(i_b, i_ref, atol=5e-2)

    print("KERNEL_OK")
</pallas_src>

<mosaic_0001>
module attributes {stable_mosaic.version = 11 : i64} {
  func.func @_breakthrough_kernel(%arg0: i32, %arg1: memref<8x32xf32, #tpu.memory_space<vmem>>, %arg2: memref<32x64xf32, #tpu.memory_space<vmem>>, %arg3: memref<1x64xf32, #tpu.memory_space<vmem>>, %arg4: memref<64x32xf32, #tpu.memory_space<vmem>>, %arg5: memref<1x32xf32, #tpu.memory_space<vmem>>, %arg6: memref<32x128xf32, #tpu.memory_space<vmem>>, %arg7: memref<1x128xf32, #tpu.memory_space<vmem>>, %arg8: memref<1x128xf32, #tpu.memory_space<vmem>>, %arg9: memref<1x1xf32, #tpu.memory_space<vmem>>, %arg10: memref<1x128xf32, #tpu.memory_space<vmem>>, %arg11: memref<1x1xf32, #tpu.memory_space<vmem>>, %arg12: memref<8x16xf32, #tpu.memory_space<vmem>>) attributes {dimension_semantics = [#tpu.dimension_semantics<parallel>], iteration_bounds = array<i64: 1>, scalar_prefetch = 0 : i64, scratch_operands = 0 : i64, tpu.core_type = #tpu.core_type<tc>, window_params = [{transform_indices = @transform_0, window_bounds = array<i64: 8, 32>}, {pipeline_mode = #tpu.pipeline_mode<synchronous>, transform_indices = @transform_1, window_bounds = array<i64: 32, 64>}, {pipeline_mode = #tpu.pipeline_mode<synchronous>, transform_indices = @transform_2, window_bounds = array<i64: 1, 64>}, {pipeline_mode = #tpu.pipeline_mode<synchronous>, transform_indices = @transform_3, window_bounds = array<i64: 64, 32>}, {pipeline_mode = #tpu.pipeline_mode<synchronous>, transform_indices = @transform_4, window_bounds = array<i64: 1, 32>}, {pipeline_mode = #tpu.pipeline_mode<synchronous>, transform_indices = @transform_5, window_bounds = array<i64: 32, 128>}, {pipeline_mode = #tpu.pipeline_mode<synchronous>, transform_indices = @transform_6, window_bounds = array<i64: 1, 128>}, {pipeline_mode = #tpu.pipeline_mode<synchronous>, transform_indices = @transform_7, window_bounds = array<i64: 1, 128>}, {pipeline_mode = #tpu.pipeline_mode<synchronous>, transform_indices = @transform_8, window_bounds = array<i64: 1, 1>}, {pipeline_mode = #tpu.pipeline_mode<synchronous>, transform_indices = @transform_9, window_bounds = array<i64: 1, 128>}, {pipeline_mode = #tpu.pipeline_mode<synchronous>, transform_indices = @transform_10, window_bounds = array<i64: 1, 1>}, {transform_indices = @transform_11, window_bounds = array<i64: 8, 16>}]} {
    %c0 = arith.constant 0 : index
    %c0_0 = arith.constant 0 : index
    %0 = vector.load %arg1[%c0, %c0_0] : memref<8x32xf32, #tpu.memory_space<vmem>>, vector<8x32xf32>
    %c0_1 = arith.constant 0 : index
    %c0_2 = arith.constant 0 : index
    %1 = vector.load %arg2[%c0_1, %c0_2] : memref<32x64xf32, #tpu.memory_space<vmem>>, vector<32x64xf32>
    %cst = arith.constant dense<0.000000e+00> : vector<8x64xf32>
    %2 = tpu.matmul %0, %1, %cst {dimension_numbers = #tpu.dot_dimension_numbers<[1], [0], [0], [1], [0, 0, 1, 1], [], []>} : vector<8x32xf32>, vector<32x64xf32>, vector<8x64xf32> -> vector<8x64xf32>
    %c0_3 = arith.constant 0 : index
    %c0_4 = arith.constant 0 : index
    %3 = vector.load %arg3[%c0_3, %c0_4] : memref<1x64xf32, #tpu.memory_space<vmem>>, vector<1x64xf32>
    %4 = vector.broadcast %3 : vector<1x64xf32> to vector<8x64xf32>
    %5 = arith.addf %2, %4 : vector<8x64xf32>
    %cst_5 = arith.constant 0.000000e+00 : f32
    %6 = vector.broadcast %cst_5 : f32 to vector<8x64xf32>
    %7 = arith.maximumf %5, %6 : vector<8x64xf32>
    %c0_6 = arith.constant 0 : index
    %c0_7 = arith.constant 0 : index
    %8 = vector.load %arg4[%c0_6, %c0_7] : memref<64x32xf32, #tpu.memory_space<vmem>>, vector<64x32xf32>
    %cst_8 = arith.constant dense<0.000000e+00> : vector<8x32xf32>
    %9 = tpu.matmul %7, %8, %cst_8 {dimension_numbers = #tpu.dot_dimension_numbers<[1], [0], [0], [1], [0, 0, 1, 1], [], []>} : vector<8x64xf32>, vector<64x32xf32>, vector<8x32xf32> -> vector<8x32xf32>
    %c0_9 = arith.constant 0 : index
    %c0_10 = arith.constant 0 : index
    %10 = vector.load %arg5[%c0_9, %c0_10] : memref<1x32xf32, #tpu.memory_space<vmem>>, vector<1x32xf32>
    %11 = vector.broadcast %10 : vector<1x32xf32> to vector<8x32xf32>
    %12 = arith.addf %9, %11 : vector<8x32xf32>
    %cst_11 = arith.constant 0.000000e+00 : f32
    %13 = vector.broadcast %cst_11 : f32 to vector<8x32xf32>
    %14 = arith.maximumf %12, %13 : vector<8x32xf32>
    %c0_12 = arith.constant 0 : index
    %c0_13 = arith.constant 0 : index
    %15 = vector.load %arg6[%c0_12, %c0_13] : memref<32x128xf32, #tpu.memory_space<vmem>>, vector<32x128xf32>
    %cst_14 = arith.constant dense<0.000000e+00> : vector<8x128xf32>
    %16 = tpu.matmul %14, %15, %cst_14 {dimension_numbers = #tpu.dot_dimension_numbers<[1], [0], [0], [1], [0, 0, 1, 1], [], []>} : vector<8x32xf32>, vector<32x128xf32>, vector<8x128xf32> -> vector<8x128xf32>
    %c0_15 = arith.constant 0 : index
    %c0_16 = arith.constant 0 : index
    %17 = vector.load %arg7[%c0_15, %c0_16] : memref<1x128xf32, #tpu.memory_space<vmem>>, vector<1x128xf32>
    %18 = vector.broadcast %17 : vector<1x128xf32> to vector<8x128xf32>
    %19 = arith.addf %16, %18 : vector<8x128xf32>
    %cst_17 = arith.constant 0.000000e+00 : f32
    %20 = vector.broadcast %cst_17 : f32 to vector<8x128xf32>
    %21 = arith.maximumf %19, %20 : vector<8x128xf32>
    %22 = tpu.iota {dimensions = array<i32: 1>} : vector<8x128xi32>
    %c7_i32 = arith.constant 7 : i32
    %23 = vector.broadcast %c7_i32 : i32 to vector<8x128xi32>
    %24 = arith.cmpi slt, %22, %23 : vector<8x128xi32>
    %cst_18 = arith.constant 0xFF800000 : f32
    %25 = vector.broadcast %cst_18 : f32 to vector<8x128xf32>
    %26 = arith.select %24, %19, %25 : vector<8x128xi1>, vector<8x128xf32>
    %cst_19 = arith.constant dense<0xFF800000> : vector<8xf32>
    %27 = vector.multi_reduction <maximumf>, %26, %cst_19 [1] : vector<8x128xf32> to vector<8xf32>
    %28 = vector.shape_cast %27 : vector<8xf32> to vector<8x1xf32>
    %29 = vector.broadcast %28 : vector<8x1xf32> to vector<8x128xf32>
    %30 = arith.subf %26, %29 : vector<8x128xf32>
    %31 = math.exp %30 : vector<8x128xf32>
    %cst_20 = arith.constant dense<0.000000e+00> : vector<8xf32>
    %32 = vector.multi_reduction <add>, %31, %cst_20 [1] : vector<8x128xf32> to vector<8xf32>
    %33 = vector.shape_cast %32 : vector<8xf32> to vector<8x1xf32>
    %34 = vector.broadcast %33 : vector<8x1xf32> to vector<8x128xf32>
    %35 = arith.divf %31, %34 : vector<8x128xf32>
    %c0_21 = arith.constant 0 : index
    %c0_22 = arith.constant 0 : index
    %36 = vector.load %arg8[%c0_21, %c0_22] : memref<1x128xf32, #tpu.memory_space<vmem>>, vector<1x128xf32>
    %37 = vector.broadcast %36 : vector<1x128xf32> to vector<8x128xf32>
    %38 = arith.mulf %21, %37 : vector<8x128xf32>
    %cst_23 = arith.constant dense<0.000000e+00> : vector<8xf32>
    %39 = vector.multi_reduction <add>, %38, %cst_23 [1] : vector<8x128xf32> to vector<8xf32>
    %40 = vector.shape_cast %39 : vector<8xf32> to vector<8x1xf32>
    %c0_24 = arith.constant 0 : index
    %c0_25 = arith.constant 0 : index
    %41 = vector.load %arg9[%c0_24, %c0_25] : memref<1x1xf32, #tpu.memory_space<vmem>>, vector<1x1xf32>
    %42 = vector.broadcast %41 : vector<1x1xf32> to vector<8x1xf32>
    %43 = arith.addf %40, %42 : vector<8x1xf32>
    %44 = arith.negf %43 : vector<8x1xf32>
    %45 = math.exp %44 : vector<8x1xf32>
    %cst_26 = arith.constant 1.000000e+00 : f32
    %46 = vector.broadcast %cst_26 : f32 to vector<8x1xf32>
    %47 = arith.addf %46, %45 : vector<8x1xf32>
    %48 = arith.divf %46, %47 : vector<8x1xf32>
    %c0_27 = arith.constant 0 : index
    %c0_28 = arith.constant 0 : index
    %49 = vector.load %arg10[%c0_27, %c0_28] : memref<1x128xf32, #tpu.memory_space<vmem>>, vector<1x128xf32>
    %50 = vector.broadcast %49 : vector<1x128xf32> to vector<8x128xf32>
    %51 = arith.mulf %21, %50 : vector<8x128xf32>
    %cst_29 = arith.constant dense<0.000000e+00> : vector<8xf32>
    %52 = vector.multi_reduction <add>, %51, %cst_29 [1] : vector<8x128xf32> to vector<8xf32>
    %53 = vector.shape_cast %52 : vector<8xf32> to vector<8x1xf32>
    %c0_30 = arith.constant 0 : index
    %c0_31 = arith.constant 0 : index
    %54 = vector.load %arg11[%c0_30, %c0_31] : memref<1x1xf32, #tpu.memory_space<vmem>>, vector<1x1xf32>
    %55 = vector.broadcast %54 : vector<1x1xf32> to vector<8x1xf32>
    %56 = arith.addf %53, %55 : vector<8x1xf32>
    %57 = arith.negf %56 : vector<8x1xf32>
    %58 = math.exp %57 : vector<8x1xf32>
    %cst_32 = arith.constant 1.000000e+00 : f32
    %59 = vector.broadcast %cst_32 : f32 to vector<8x1xf32>
    %60 = arith.addf %59, %58 : vector<8x1xf32>
    %61 = arith.divf %59, %60 : vector<8x1xf32>
    %62 = vector.extract_strided_slice %35 {offsets = [0, 0], sizes = [8, 16], strides = [1, 1]} : vector<8x128xf32> to vector<8x16xf32>
    %63 = tpu.iota {dimensions = array<i32: 1>} : vector<8x16xi32>
    %c7_i32_33 = arith.constant 7 : i32
    %64 = vector.broadcast %c7_i32_33 : i32 to vector<8x16xi32>
    %65 = arith.cmpi eq, %63, %64 : vector<8x16xi32>
    %cst_34 = arith.constant 0.000000e+00 : f32
    %66 = vector.shape_cast %48 : vector<8x1xf32> to vector<8x1xf32>
    %67 = vector.broadcast %66 : vector<8x1xf32> to vector<8x16xf32>
    %68 = vector.broadcast %cst_34 : f32 to vector<8x16xf32>
    %69 = arith.select %65, %67, %68 : vector<8x16xi1>, vector<8x16xf32>
    %70 = arith.addf %62, %69 : vector<8x16xf32>
    %c8_i32 = arith.constant 8 : i32
    %71 = vector.broadcast %c8_i32 : i32 to vector<8x16xi32>
    %72 = arith.cmpi eq, %63, %71 : vector<8x16xi32>
    %cst_35 = arith.constant 0.000000e+00 : f32
    %73 = vector.shape_cast %61 : vector<8x1xf32> to vector<8x1xf32>
    %74 = vector.broadcast %73 : vector<8x1xf32> to vector<8x16xf32>
    %75 = vector.broadcast %cst_35 : f32 to vector<8x16xf32>
    %76 = arith.select %72, %74, %75 : vector<8x16xi1>, vector<8x16xf32>
    %77 = arith.addf %70, %76 : vector<8x16xf32>
    %c0_36 = arith.constant 0 : index
    %c0_37 = arith.constant 0 : index
    %78 = vector.load %arg12[%c0_36, %c0_37] : memref<8x16xf32, #tpu.memory_space<vmem>>, vector<8x16xf32>
    tpu.vector_store %arg12[%c0_36, %c0_37], %77 {strides = array<i32>} : memref<8x16xf32, #tpu.memory_space<vmem>>, vector<8x16xf32>,
    return
  }
  func.func @transform_0(%arg0: i32) -> (i32, i32) {
    %c0_i32 = arith.constant 0 : i32
    %c0_i32_0 = arith.constant 0 : i32
    return %arg0, %c0_i32 : i32, i32
  }
  func.func @transform_1(%arg0: i32) -> (i32, i32) {
    %c0_i32 = arith.constant 0 : i32
    %c0_i32_0 = arith.constant 0 : i32
    %c0_i32_1 = arith.constant 0 : i32
    return %c0_i32, %c0_i32_0 : i32, i32
  }
  func.func @transform_2(%arg0: i32) -> (i32, i32) {
    %c0_i32 = arith.constant 0 : i32
    %c0_i32_0 = arith.constant 0 : i32
    %c0_i32_1 = arith.constant 0 : i32
    return %c0_i32, %c0_i32_0 : i32, i32
  }
  func.func @transform_3(%arg0: i32) -> (i32, i32) {
    %c0_i32 = arith.constant 0 : i32
    %c0_i32_0 = arith.constant 0 : i32
    %c0_i32_1 = arith.constant 0 : i32
    return %c0_i32, %c0_i32_0 : i32, i32
  }
  func.func @transform_4(%arg0: i32) -> (i32, i32) {
    %c0_i32 = arith.constant 0 : i32
    %c0_i32_0 = arith.constant 0 : i32
    %c0_i32_1 = arith.constant 0 : i32
    return %c0_i32, %c0_i32_0 : i32, i32
  }
  func.func @transform_5(%arg0: i32) -> (i32, i32) {
    %c0_i32 = arith.constant 0 : i32
    %c0_i32_0 = arith.constant 0 : i32
    %c0_i32_1 = arith.constant 0 : i32
    return %c0_i32, %c0_i32_0 : i32, i32
  }
  func.func @transform_6(%arg0: i32) -> (i32, i32) {
    %c0_i32 = arith.constant 0 : i32
    %c0_i32_0 = arith.constant 0 : i32
    %c0_i32_1 = arith.constant 0 : i32
    return %c0_i32, %c0_i32_0 : i32, i32
  }
  func.func @transform_7(%arg0: i32) -> (i32, i32) {
    %c0_i32 = arith.constant 0 : i32
    %c0_i32_0 = arith.constant 0 : i32
    %c0_i32_1 = arith.constant 0 : i32
    return %c0_i32, %c0_i32_0 : i32, i32
  }
  func.func @transform_8(%arg0: i32) -> (i32, i32) {
    %c0_i32 = arith.constant 0 : i32
    %c0_i32_0 = arith.constant 0 : i32
    %c0_i32_1 = arith.constant 0 : i32
    return %c0_i32, %c0_i32_0 : i32, i32
  }
  func.func @transform_9(%arg0: i32) -> (i32, i32) {
    %c0_i32 = arith.constant 0 : i32
    %c0_i32_0 = arith.constant 0 : i32
    %c0_i32_1 = arith.constant 0 : i32
    return %c0_i32, %c0_i32_0 : i32, i32
  }
  func.func @transform_10(%arg0: i32) -> (i32, i32) {
    %c0_i32 = arith.constant 0 : i32
    %c0_i32_0 = arith.constant 0 : i32
    %c0_i32_1 = arith.constant 0 : i32
    return %c0_i32, %c0_i32_0 : i32, i32
  }
  func.func @transform_11(%arg0: i32) -> (i32, i32) {
    %c0_i32 = arith.constant 0 : i32
    %c0_i32_0 = arith.constant 0 : i32
    return %arg0, %c0_i32 : i32, i32
  }
}

</mosaic_0001>

<bundles_post_ra>
// kernel: tpu_custom_call.1
= control target key start
LH: loop header
LB: loop body
LE: loop exit
PB: predicated region body
PF: predicated region fallthrough
CT: control target
= control target key end

     0   :  { %s466_s0 = inlined_call_operand.vmem [shape: f32[8,32], index: 0, kind: input, shape index: {}]   ;;  %s467_s1 = inlined_call_operand.vmem [shape: f32[32,64], index: 1, kind: input, shape index: {}]   ;;  %s468_s2 = inlined_call_operand.vmem [shape: f32[1,64], index: 2, kind: input, shape index: {}]   ;;  %s469_s3 = inlined_call_operand.vmem [shape: f32[64,32], index: 3, kind: input, shape index: {}]   ;;  %s470_s4 = inlined_call_operand.vmem [shape: f32[1,32], index: 4, kind: input, shape index: {}]   ;;  %s471_s5 = inlined_call_operand.vmem [shape: f32[32,128], index: 5, kind: input, shape index: {}]   ;;  %s472_s6 = inlined_call_operand.vmem [shape: f32[1,128], index: 6, kind: input, shape index: {}]   ;;  %s473_s7 = inlined_call_operand.vmem [shape: f32[1,128], index: 7, kind: input, shape index: {}]   ;;  %s474_s8 = inlined_call_operand.<no memory space> [shape: f32[1,1], index: 8, kind: input, shape index: {}]   ;;  %s475_s9 = inlined_call_operand.vmem [shape: f32[1,128], index: 9, kind: input, shape index: {}]   ;;  %s476_s11 = inlined_call_operand.hbm [shape: f32[8,16], index: 11, kind: output, shape index: {}]   ;;  %s477_s10 = inlined_call_operand.<no memory space> [shape: f32[1,1], index: 10, kind: input, shape index: {}]  }
   0x1   :  { %v16_v0 = vstv %s474_s8  ;;  %v18_v1 = vstv %s477_s10 }
   0x2   :  { %17 = vst [vmem:[#allocation2] sm:$0x1] %v16_v0 }
   0x3   :  { %19 = vst [vmem:[#allocation3] sm:$0x1] %v18_v1 }
   0x4   :  { %v47_v2 = vld [vmem:[%s467_s1 + $0x18] sm:$0xff]  ;;  %v46_v3 = vld [vmem:[%s467_s1 + $0x10] sm:$0xff]  ;;  %v45_v5 = vld [vmem:[%s467_s1 + $0x8] sm:$0xff]  ;;  %vm52_vm0 = vcmask 261120  }
   0x5   :  { %68 = vmatpush.msra.mxu0 %v47_v2  ;;  %v84_v4 = vld [vmem:[%s469_s3 + $0x38] sm:$0xff]  ;;  %v44_v6 = vld [vmem:[%s467_s1] sm:$0xff]  ;;  %v83_v7 = vld [vmem:[%s469_s3 + $0x30] sm:$0xff] }
   0x6   :  { %101 = vmatpush.msra.mxu1 %v84_v4  ;;  %v43_v8 = vld [vmem:[%s466_s0] sm:$0xff]  ;;  %v82_v9 = vld [vmem:[%s469_s3 + $0x28] sm:$0xff] }
   0x7   :  { %69 = vmatpush.msra.mxu0 %v46_v3  ;;  %v81_v10 = vld [vmem:[%s469_s3 + $0x20] sm:$0xff] }
   0x8   :  { %102 = vmatpush.msra.mxu1 %v83_v7 }
   0x9   :  { %70 = vmatpush.msra.mxu0 %v45_v5 }
   0xa   :  { %103 = vmatpush.msra.mxu1 %v82_v9 }
   0xb   :  { %20 = vsyncpa [#allocation5], 0  ;;  %71 = vmatpush.msra.mxu0 %v44_v6  ;;  %v80_v11 = vld [vmem:[%s469_s3 + $0x18] sm:$0xff]  ;;  %v79_v12 = vld [vmem:[%s469_s3 + $0x10] sm:$0xff]  ;;  %vm89_vm1 = vcmask 523264   ;;  %v146_v27 = vlaneseq  ;;  %v322_v38 = vmov 0  }
   0xc   :  { %268 = vmatmul.msk.f32.vlgmr.msra.gmra.mxu0 %vm52_vm0, %v43_v8  ;;  %104 = vmatpush.msra.mxu1 %v81_v10  ;;  %v78_v13 = vld [vmem:[%s469_s3 + $0x8] sm:$0xff]  ;;  %v77_v14 = vld [vmem:[%s469_s3] sm:$0xff]  ;;  %v117_v15 = vld [vmem:[%s471_s5 + $0x18] sm:$0xff]  ;;  %s259_s1 = sshll.u32 %s476_s11, 4  ;;  %s260_s1 = int_to_ptr.hbm [resolvable:$true] %s259_s1 }
   0xd   :  { %137 = vmatpush.msra.mxu2 %v117_v15  ;;  %v277_v16 = vld [vmem:[%s468_s2] ss:$0 sm:$0xff]  ;;  %v116_v20 = vld [vmem:[%s471_s5 + $0x10] sm:$0xff]  ;;  %v115_v21 = vld [vmem:[%s471_s5 + $0x8] sm:$0xff]  ;;  %v449_v28 = vand.u32 127, %v146_v27  ;;  %275 = vset.pattern.permute.xlu2 %v322_v38 }
   0xe   :  { %105 = vmatpush.msra.mxu1 %v80_v11  ;;  %v114_v22 = vld [vmem:[%s471_s5] sm:$0xff]  ;;  %276 = vset.pattern.permute.xlu0 %v322_v38 }
   0xf   :  { %138 = vmatpush.msra.mxu2 %v116_v20  ;;  %v278_v23 = vld [vmem:[%s470_s4] ss:$0 sm:$0xff]  ;;  %vm148_vm2 = vcmp.lt.s32.totalorder %v449_v28, 7  ;;  %v282_v40 = vld [vmem:[#allocation3] ss:$0 sm:$0xff]  ;;  %vm234_vm15 = vcmp.eq.s32.totalorder %v449_v28, 7 }
  0x10   :  { %106 = vmatpush.msra.mxu1 %v79_v12  ;;  %v279_v29 = vld [vmem:[%s472_s6] ss:$0 sm:$0xff]  ;;  %s323_s6 = smov [#allocation4]  }
  0x11   :  { %139 = vmatpush.msra.mxu2 %v115_v21  ;;  %v280_v32 = vld [vmem:[%s475_s9] ss:$0 sm:$0xff] }
  0x12   :  { %107 = vmatpush.msra.mxu1 %v78_v13  ;;  %v281_v36 = vld [vmem:[%s473_s7] ss:$0 sm:$0xff]  ;;  %s257_s7 = sshll.u32 %s323_s6, 4  ;;  %s258_s7 = int_to_ptr.vmem [resolvable:$true] %s257_s7 }
  0x13   :  { %140 = vmatpush.msra.mxu2 %v114_v22  ;;  %v283_v45 = vld [vmem:[#allocation2] ss:$0 sm:$0xff] }
  0x14   :  { %108 = vmatpush.msra.mxu1 %v77_v14 }
  0x89   :  { %v73_v17 = vpop.f32.mrf.mxu0 }
  0x8a   :  { %v74_v18 = vadd.f32 %v277_v16, %v73_v17 }
  0x8c   :  { %v76_v19 = vmax.f32 %v74_v18, 0.0 }
  0x8e   :  { %269 = vmatmul.msk.f32.vlgmr.msra.gmra.mxu1 %vm89_vm1, %v76_v19  ;;  %vm250_vm1 = vcmask 130048  }
 0x10b   :  { %v110_v24 = vpop.f32.mrf.mxu1 }
 0x10c   :  { %v111_v25 = vadd.f32 %v278_v23, %v110_v24 }
 0x10e   :  { %v113_v26 = vmax.f32 %v111_v25, 0.0 }
 0x110   :  { %270 = vmatmul.msk.f32.vlgmr.msra.gmra.mxu2 %vm52_vm0, %v113_v26  ;;  %vm242_vm0 = vcmp.eq.s32.totalorder %v449_v28, 8 }
 0x193   :  { %v142_v30 = vpop.f32.mrf.mxu2 }
 0x194   :  { %v143_v31 = vadd.f32 %v279_v29, %v142_v30 }
 0x196   :  { %v149_v33 = vsel %vm148_vm2, %v143_v31, -inf  ;;  %v145_v34 = vmax.f32 %v143_v31, 0.0 }
 0x197   :  { %150 = vmax.xlane.f32.xlu0 %v149_v33 }
 0x198   :  { %v207_v35 = vmul.f32 %v280_v32, %v145_v34  ;;  %v176_v37 = vmul.f32 %v281_v36, %v145_v34 }
 0x19a   :  { %208 = vadd.xlane.f32.xlu1 %v207_v35 }
 0x19f   :  { %177 = vadd.xlane.f32.xlu0 %v176_v37 }
 0x20a   :  { %v151_v39 = vpop.xlane.xlu0 %150 }
 0x20b   :  { %v152_v41 = vsub.f32 %v149_v33, %v151_v39 }
 0x20d   :  { %v153_v42 = vmul.f32 1.442695, %v152_v41  ;;  %v209_v43 = vpop.xlane.xlu1 %208 }
 0x20e   :  { %v214_v44 = vadd.f32 %v282_v40, %v209_v43 }
 0x20f   :  { %284 = vpow2.f32 %v153_v42 }
 0x210   :  { %v272_v46 = vmul.f32 -1.442695, %v214_v44 }
 0x212   :  { %286 = vpow2.f32 %v272_v46  ;;  %v178_v47 = vpop.xlane.xlu0 %177 }
 0x213   :  { %v183_v48 = vadd.f32 %v283_v45, %v178_v47 }
 0x215   :  { %v285_v49 = vpop.eup %284  ;;  %v271_v50 = vmul.f32 -1.442695, %v183_v48 }
 0x216   :  { %155 = vadd.xlane.f32.xlu1 %v285_v49 }
 0x217   :  { %288 = vpow2.f32 %v271_v50 }
 0x218   :  { %v287_v51 = vpop.eup %286 }
 0x219   :  { %v218_v52 = vadd.f32 1.0, %v287_v51 }
 0x21b   :  { %290 = vrcp.f32 %v218_v52  ;;  %v230_v6 = vand.u32 2147483648, %v218_v52  ;;  %vm224_vm8 = vweird.f32 %v218_v52  ;;  %v228_v7 = vand.u32 2147483647, %v218_v52 }
 0x21d   :  { %v289_v53 = vpop.eup %288  ;;  %v231_v9 = vor.u32 1.1754944e-38, %v230_v6  ;;  %vm229_vm10 = vcmp.eq.f32.partialorder %v228_v7, 8.507059e+37 }
 0x21e   :  { %v187_v54 = vadd.f32 1.0, %v289_v53 }
 0x220   :  { %292 = vrcp.f32 %v187_v54  ;;  %v199_v61 = vand.u32 2147483648, %v187_v54  ;;  %v197_v63 = vand.u32 2147483647, %v187_v54  ;;  %vm193_vm4 = vweird.f32 %v187_v54 }
 0x221   :  { %v291_v55 = vpop.eup %290 }
 0x222   :  { %v220_v56 = vmul.f32 %v291_v55, %v218_v52  ;;  %v200_v2 = vor.u32 1.1754944e-38, %v199_v61  ;;  %vm198_vm6 = vcmp.eq.f32.partialorder %v197_v63, 8.507059e+37  ;;  %vm225_vm7 = vweird.f32 %v291_v55 }
 0x223   :  { %vm226_vm9 = vmor %vm224_vm8, %vm225_vm7 }
 0x224   :  { %v221_v60 = vsub.f32 1.0, %v220_v56 }
 0x226   :  { %v293_v57 = vpop.eup %292  ;;  %v222_v1 = vmul.f32 %v291_v55, %v221_v60 }
 0x227   :  { %v189_v58 = vmul.f32 %v293_v57, %v187_v54  ;;  %vm194_vm3 = vweird.f32 %v293_v57 }
 0x228   :  { %vm195_vm5 = vmor %vm193_vm4, %vm194_vm3  ;;  %v223_v5 = vadd.f32 %v291_v55, %v222_v1 }
 0x229   :  { %v190_v59 = vsub.f32 1.0, %v189_v58 }
 0x22a   :  { %v227_v8 = vsel %vm226_vm9, %v291_v55, %v223_v5 }
 0x22b   :  { %v191_v62 = vmul.f32 %v293_v57, %v190_v59  ;;  %v232_v10 = vsel %vm229_vm10, %v231_v9, %v227_v8 }
 0x22d   :  { %v192_v0 = vadd.f32 %v293_v57, %v191_v62 }
 0x22f   :  { %v196_v3 = vsel %vm195_vm5, %v293_v57, %v192_v0 }
 0x230   :  { %v201_v4 = vsel %vm198_vm6, %v200_v2, %v196_v3 }
 0x231   :  { %237 = vperm.xlu2 %275, %v201_v4  }
 0x239   :  { %245 = vperm.xlu2 %275, %v232_v10  }
 0x289   :  { %v156_v11 = vpop.xlane.xlu1 %155 }
 0x28a   :  { %294 = vrcp.f32 %v156_v11  ;;  %v168_v16 = vand.u32 2147483648, %v156_v11  ;;  %v166_v18 = vand.u32 2147483647, %v156_v11  ;;  %vm162_vm12 = vweird.f32 %v156_v11 }
 0x28b   :  { %v238_v14 = vpop.permute.xlu2 %237 }
 0x28c   :  { %v169_v20 = vor.u32 1.1754944e-38, %v168_v16  ;;  %vm167_vm14 = vcmp.eq.f32.partialorder %v166_v18, 8.507059e+37  ;;  %v240_v25 = vsel %vm234_vm15, %v238_v14, 0.0 }
 0x290   :  { %v295_v12 = vpop.eup %294 }
 0x291   :  { %v158_v13 = vmul.f32 %v295_v12, %v156_v11  ;;  %vm163_vm11 = vweird.f32 %v295_v12 }
 0x292   :  { %vm164_vm13 = vmor %vm162_vm12, %vm163_vm11 }
 0x293   :  { %v159_v15 = vsub.f32 1.0, %v158_v13  ;;  %v246_v24 = vpop.permute.xlu2 %245 }
 0x294   :  { %v248_v27 = vsel %vm242_vm0, %v246_v24, 0.0 }
 0x295   :  { %v160_v17 = vmul.f32 %v295_v12, %v159_v15 }
 0x297   :  { %v161_v19 = vadd.f32 %v295_v12, %v160_v17 }
 0x299   :  { %v165_v21 = vsel %vm164_vm13, %v295_v12, %v161_v19 }
 0x29a   :  { %v170_v22 = vsel %vm167_vm14, %v169_v20, %v165_v21 }
 0x29b   :  { %v171_v23 = vmul.f32 %v285_v49, %v170_v22 }
 0x29d   :  { %v241_v26 = vadd.f32 %v240_v25, %v171_v23 }
 0x29f   :  { %v249_v29 = vadd.f32 %v248_v27, %v241_v26 }
 0x2a1   :  { %251 = vst.msk [vmem:[#allocation4] sm:$0xff] %vm250_vm1, %v249_v29 }
 0x2a2   :  { %262 = dma.vmem_to_hbm [thread:$0]  %s258_s7, 128, %s260_s1, [#allocation5]  }
 0x2a3   :  { %320 = dma.done.wait [#allocation5], 128  }
 0x2a4   :  { %321 = vsyncadd [#allocation5], 4294967168 }
 0x2a5   :  { %267 = vsyncpa [#allocation5], 1 }

</bundles_post_ra>
